<compile_context>
chip_gen: v5e
topology: v5e:2x2
jax: 0.10.0
libtpu: 0.0.40
codegen_flags: <defaults>
</compile_context>

<pallas_src>
import math

import jax
import jax.numpy as jnp
from jax.experimental import pallas as pl
from jax.experimental.pallas import tpu as pltpu


_TAPS = 4  # number of 2x2 up-conv taps (kh, kw); block count of the fused RHS


# =============================================================================
# Fused Pallas kernel
# =============================================================================

def _c_att_kernel(pt_ref, xp_ref, wdt_ref, bdt_ref, wut_ref, but_ref, sak_ref, o_ref):
    """Fused C_Att forward (vertical branch + residual softmax + combine).

    pt_ref : (4*C*9, B*OW)  transposed superpatch; column (b, ow), row (j, ci, r, s)
    xp_ref : (B, W, H, C)   x.permute(0,3,2,1)  (residual softmax branch, module layout)
    wdt_ref: (4*2C, 4*C*9)  block-diagonal down-conv weight, transposed
    bdt_ref: (4*2C, 1)      tiled down-conv bias (column)
    wut_ref: (C, 4*2C)      reordered up-conv weight, transposed (cols = (kh, kw, ci))
    but_ref: (C, 1)         up-conv bias (column)
    sak_ref: (1,) in SMEM   Sakura_Mint
    o_ref  : (B, W, H, C)   output directly in the module's layout
    """
    sak = sak_ref[0]
    B, W, H, C = o_ref.shape
    OW = pt_ref.shape[1] // B            # = H // 4 = C under the asserted config

    # Vertical branch: Convd(3x3,s2,p1) -> ReLU -> Convu(2x2,s2) as two back-to-back
    # MXU dots in the transposed orientation (no in-kernel reshape/transpose needed).
    yT = jnp.dot(wdt_ref[...], pt_ref[...], preferred_element_type=jnp.float32)
    yT = jnp.maximum(yT + bdt_ref[...], 0.0)                 # (4*2C, B*OW)
    uT = jnp.dot(wut_ref[...], yT, preferred_element_type=jnp.float32) + but_ref[...]
    # uT[co, b*OW + ow] == W_Vertical[b, co, 0, ow]

    # Residual: Softmax(dim=1)(x.permute(0,3,2,1)) == softmax over axis 1 of xp,
    # computed batched on the whole (B, W, H, C) block in one shot.
    xp = xp_ref[...]
    mx = jnp.max(xp, axis=1, keepdims=True)
    ex = jnp.exp(xp - mx)
    xs = ex * pl.reciprocal(jnp.sum(ex, axis=1, keepdims=True), approx=True)

    # Return_H = Softmax(dim=2)(horizontal chain): dim 2 has extent 1 under this
    # configuration, so Return_H == 1 exactly; the whole horizontal conv chain is
    # dead work and has been removed (also avoids the exp(inf-inf) NaN hazard).
    for b in range(B):                   # B == 2; per-iter work: one (W, C) softmax + store
        ut_b = uT[:, b * OW:(b + 1) * OW]                    # (W, C) indexed [co=w, ow=c]
        m = jnp.max(ut_b, axis=-1, keepdims=True)
        e = jnp.exp(ut_b - m)
        ret_w = e * pl.reciprocal(jnp.sum(e, axis=-1, keepdims=True), approx=True)
        # module_out[b, w, h, c] = sak * (1 + Return_W[b, w, 0, c]) + xs[b, w, h, c]
        o_ref[b] = sak * (1.0 + ret_w)[:, None, :] + xs[b]


# =============================================================================
# Wrapper-side preprocessing
# =============================================================================

def _build_superpatch_t(z):
    """Transposed superpatch LHS for the fused Convd(3x3,s2,p1)+Convu(2x2,s2) chain.

    z: (B, Cin, 4, S2) branch input (channels first; first spatial dim == 4 so the
    up-conv output height is 1).  Returns (4*Cin*9, B*S2//4); column (b, ow), row
    (j = 2*kh + kw, ci, r, s) holds zpad[b, ci, 2*kh + r, 4*ow + 2*kw + s], i.e. the
    down-conv patch feeding down-conv output position (o1=kh, o2=2*ow+kw).
    """
    B, Cin, S1, S2 = z.shape
    assert S1 == 4 and S2 % 4 == 0
    OW = S2 // 4
    zp = jnp.pad(z, ((0, 0), (0, 0), (1, 1), (1, 1)))
    rows = (2 * jnp.arange(2)[:, None] + jnp.arange(3)[None, :]).reshape(-1)    # 2*kh + r
    cols = (4 * jnp.arange(OW)[:, None, None] + 2 * jnp.arange(2)[None, :, None]
            + jnp.arange(3)[None, None, :]).reshape(-1)                         # 4*ow + 2*kw + s
    g = zp[:, :, rows, :][:, :, :, cols]            # (B, Cin, 6, 6*OW)
    g = g.reshape(B, Cin, 2, 3, OW, 2, 3)           # (B, ci, kh, r, ow, kw, s)
    g = g.transpose(2, 5, 1, 3, 6, 0, 4)            # (kh, kw, ci, r, s, B, ow)
    return g.reshape(_TAPS * Cin * 9, B * OW)


def prepare_params(p):
    """One-time weight preprocessing (HOISTED out of the jitted per-call path).

    Only the vertical branch is needed: Return_H == 1 under the supported config.
    """
    cd, cin = p["v_d_w"].shape[:2]
    wm = p["v_d_w"].reshape(cd, cin * 9).T                       # rows (ci, r, s)
    wdt = jnp.kron(jnp.eye(_TAPS, dtype=wm.dtype), wm).T         # (4*2C, 4*Cin*9)
    bdt = jnp.tile(p["v_d_b"], _TAPS)[:, None]                   # (4*2C, 1)
    cu, cdu = p["v_u_w"].shape[:2]
    wut = p["v_u_w"].transpose(2, 3, 1, 0).reshape(_TAPS * cdu, cu).T   # (C, 4*2C)
    but = p["v_u_b"][:, None]                                    # (C, 1)
    return dict(wdt=wdt, bdt=bdt, wut=wut, but=but, sakura=p["sakura"])


def c_att_forward(x, prep):
    B, C, H, W = x.shape
    # The PyTorch module only type-checks / broadcasts for W == in_dim == C and
    # H == 4 * in_dim; the fused kernel specialises to that configuration.
    assert W == C and H == 4 * C and C == 4

    xv = jnp.transpose(x, (0, 1, 3, 2))      # (B, C, W, H): vertical branch input
    pt = _build_superpatch_t(xv)             # (4*C*9, B*OW)
    xp = jnp.transpose(x, (0, 3, 2, 1))      # (B, W, H, C): residual branch, module layout

    def full(shape):
        return pl.BlockSpec(shape, lambda i, n=len(shape): (0,) * n)

    # Note (v7x): gridding over B with dimension_semantics=("parallel",) would engage
    # the second TensorCore, but at B=2 the per-step overhead exceeds the gain.
    return pl.pallas_call(
        _c_att_kernel,
        out_shape=jax.ShapeDtypeStruct((B, W, H, C), jnp.float32),
        grid=(1,),
        in_specs=[full(pt.shape), full(xp.shape), full(prep["wdt"].shape),
                  full(prep["bdt"].shape), full(prep["wut"].shape),
                  full(prep["but"].shape),
                  pl.BlockSpec(memory_space=pltpu.MemorySpace.SMEM)],
        out_specs=full((B, W, H, C)),
        compiler_params=pltpu.CompilerParams(dimension_semantics=("arbitrary",)),
        cost_estimate=pl.CostEstimate(flops=80_000, transcendentals=700,
                                      bytes_accessed=30_000),
    )(pt, xp, prep["wdt"], prep["bdt"], prep["wut"], prep["but"], prep["sakura"])


# =============================================================================
# Deterministic parameter init (shapes from C_Att.__init__ with in_dim=4)
# =============================================================================

def init_params(key, in_dim):
    ks = jax.random.split(key, 8)

    def conv_init(kw_, kb_, oc, ic, k):
        bound = 1.0 / math.sqrt(ic * k * k)
        w = jax.random.uniform(kw_, (oc, ic, k, k), jnp.float32, -bound, bound)
        b = jax.random.uniform(kb_, (oc,), jnp.float32, -bound, bound)
        return w, b

    h_d_w, h_d_b = conv_init(ks[0], ks[1], 2 * in_dim, in_dim, 3)
    v_d_w, v_d_b = conv_init(ks[2], ks[3], 2 * in_dim, in_dim, 3)
    h_u_w, h_u_b = conv_init(ks[4], ks[5], in_dim, 2 * in_dim, 2)
    v_u_w, v_u_b = conv_init(ks[6], ks[7], in_dim, 2 * in_dim, 2)
    # PyTorch initializes Sakura_Mint to zeros(1); we use a nonzero deterministic
    # value so the conv branch actually contributes to the output.
    sakura = jnp.array([0.5], dtype=jnp.float32)
    return dict(h_d_w=h_d_w, h_d_b=h_d_b, v_d_w=v_d_w, v_d_b=v_d_b,
                h_u_w=h_u_w, h_u_b=h_u_b, v_u_w=v_u_w, v_u_b=v_u_b,
                sakura=sakura)


# =============================================================================
# Pure-JAX reference (full forward, including the horizontal branch)
# =============================================================================

def c_att_reference(x, p):
    def conv(z, w, b, stride, pad):
        out = jax.lax.conv_general_dilated(
            z, w, (stride, stride), [(pad, pad), (pad, pad)],
            dimension_numbers=("NCHW", "OIHW", "NCHW"),
            precision=jax.lax.Precision.HIGHEST)
        return out + b[None, :, None, None]

    xv = jnp.transpose(x, (0, 1, 3, 2))
    wv = conv(xv, p["v_d_w"], p["v_d_b"], 2, 1)
    wv = jax.nn.relu(wv)
    wv = conv(wv, p["v_u_w"], p["v_u_b"], 2, 0)
    ret_w = jax.nn.softmax(wv, axis=3)

    xh = jnp.transpose(x, (0, 3, 1, 2))
    hh = conv(xh, p["h_d_w"], p["h_d_b"], 2, 1)
    hh = jax.nn.relu(hh)
    hh = conv(hh, p["h_u_w"], p["h_u_b"], 2, 0)
    ret_h = jax.nn.softmax(hh, axis=2)

    xs = jax.nn.softmax(jnp.transpose(x, (0, 3, 2, 1)), axis=1)
    return p["sakura"][0] * (ret_h + ret_w) + xs


# =============================================================================
# Main
# =============================================================================

if __name__ == "__main__":
    in_dim = 4
    # Module constraints: C == W == in_dim, H == 4 * in_dim.
    B, C, H, W = 2, in_dim, 4 * in_dim, in_dim

    key = jax.random.PRNGKey(0)
    kx, kp = jax.random.split(key)
    x = jax.random.normal(kx, (B, C, H, W), dtype=jnp.float32)
    params = init_params(kp, in_dim)

    # Weight preprocessing runs ONCE per parameter set, outside the jitted path.
    prep = prepare_params(params)

    fwd = jax.jit(c_att_forward)
    out = jax.block_until_ready(fwd(x, prep))
    ref = jax.block_until_ready(c_att_reference(x, params))

    assert out.shape == ref.shape, (out.shape, ref.shape)
    err = float(jnp.max(jnp.abs(out - ref)))
    assert err < 1e-2, err

    print("KERNEL_OK")
</pallas_src>

<mosaic_0001>
module attributes {stable_mosaic.version = 11 : i64} {
  func.func @_c_att_kernel(%arg0: i32, %arg1: memref<144x8xf32, #tpu.memory_space<vmem>>, %arg2: memref<2x4x16x4xf32, #tpu.memory_space<vmem>>, %arg3: memref<32x144xf32, #tpu.memory_space<vmem>>, %arg4: memref<32x1xf32, #tpu.memory_space<vmem>>, %arg5: memref<4x32xf32, #tpu.memory_space<vmem>>, %arg6: memref<4x1xf32, #tpu.memory_space<vmem>>, %arg7: memref<1xf32, #tpu.memory_space<smem>>, %arg8: memref<2x4x16x4xf32, #tpu.memory_space<vmem>>) attributes {dimension_semantics = [#tpu.dimension_semantics<arbitrary>], iteration_bounds = array<i64: 1>, scalar_prefetch = 0 : i64, scratch_operands = 0 : i64, tpu.core_type = #tpu.core_type<tc>, window_params = [{pipeline_mode = #tpu.pipeline_mode<synchronous>, transform_indices = @transform_0, window_bounds = array<i64: 144, 8>}, {pipeline_mode = #tpu.pipeline_mode<synchronous>, transform_indices = @transform_1, window_bounds = array<i64: 2, 4, 16, 4>}, {pipeline_mode = #tpu.pipeline_mode<synchronous>, transform_indices = @transform_2, window_bounds = array<i64: 32, 144>}, {pipeline_mode = #tpu.pipeline_mode<synchronous>, transform_indices = @transform_3, window_bounds = array<i64: 32, 1>}, {pipeline_mode = #tpu.pipeline_mode<synchronous>, transform_indices = @transform_4, window_bounds = array<i64: 4, 32>}, {pipeline_mode = #tpu.pipeline_mode<synchronous>, transform_indices = @transform_5, window_bounds = array<i64: 4, 1>}, {transform_indices = @transform_6, window_bounds = array<i64: 1>}, {pipeline_mode = #tpu.pipeline_mode<synchronous>, transform_indices = @transform_7, window_bounds = array<i64: 2, 4, 16, 4>}]} {
    %c0 = arith.constant 0 : index
    %0 = memref.load %arg7[%c0] : memref<1xf32, #tpu.memory_space<smem>>
    %c0_0 = arith.constant 0 : index
    %c0_1 = arith.constant 0 : index
    %1 = vector.load %arg3[%c0_0, %c0_1] : memref<32x144xf32, #tpu.memory_space<vmem>>, vector<32x144xf32>
    %c0_2 = arith.constant 0 : index
    %c0_3 = arith.constant 0 : index
    %2 = vector.load %arg1[%c0_2, %c0_3] : memref<144x8xf32, #tpu.memory_space<vmem>>, vector<144x8xf32>
    %cst = arith.constant dense<0.000000e+00> : vector<32x8xf32>
    %3 = tpu.matmul %1, %2, %cst {dimension_numbers = #tpu.dot_dimension_numbers<[1], [0], [0], [1], [0, 0, 1, 1], [], []>} : vector<32x144xf32>, vector<144x8xf32>, vector<32x8xf32> -> vector<32x8xf32>
    %c0_4 = arith.constant 0 : index
    %c0_5 = arith.constant 0 : index
    %4 = vector.load %arg4[%c0_4, %c0_5] : memref<32x1xf32, #tpu.memory_space<vmem>>, vector<32x1xf32>
    %5 = vector.broadcast %4 : vector<32x1xf32> to vector<32x8xf32>
    %6 = arith.addf %3, %5 : vector<32x8xf32>
    %cst_6 = arith.constant 0.000000e+00 : f32
    %7 = vector.broadcast %cst_6 : f32 to vector<32x8xf32>
    %8 = arith.maximumf %6, %7 : vector<32x8xf32>
    %c0_7 = arith.constant 0 : index
    %c0_8 = arith.constant 0 : index
    %9 = vector.load %arg5[%c0_7, %c0_8] : memref<4x32xf32, #tpu.memory_space<vmem>>, vector<4x32xf32>
    %cst_9 = arith.constant dense<0.000000e+00> : vector<4x8xf32>
    %10 = tpu.matmul %9, %8, %cst_9 {dimension_numbers = #tpu.dot_dimension_numbers<[1], [0], [0], [1], [0, 0, 1, 1], [], []>} : vector<4x32xf32>, vector<32x8xf32>, vector<4x8xf32> -> vector<4x8xf32>
    %c0_10 = arith.constant 0 : index
    %c0_11 = arith.constant 0 : index
    %11 = vector.load %arg6[%c0_10, %c0_11] : memref<4x1xf32, #tpu.memory_space<vmem>>, vector<4x1xf32>
    %12 = vector.broadcast %11 : vector<4x1xf32> to vector<4x8xf32>
    %13 = arith.addf %10, %12 : vector<4x8xf32>
    %c0_12 = arith.constant 0 : index
    %c0_13 = arith.constant 0 : index
    %c0_14 = arith.constant 0 : index
    %c0_15 = arith.constant 0 : index
    %14 = vector.load %arg2[%c0_12, %c0_13, %c0_14, %c0_15] : memref<2x4x16x4xf32, #tpu.memory_space<vmem>>, vector<2x4x16x4xf32>
    %cst_16 = arith.constant dense<0xFF800000> : vector<2x16x4xf32>
    %15 = vector.multi_reduction <maximumf>, %14, %cst_16 [1] : vector<2x4x16x4xf32> to vector<2x16x4xf32>
    %16 = vector.shape_cast %15 : vector<2x16x4xf32> to vector<2x1x16x4xf32>
    %17 = vector.broadcast %16 : vector<2x1x16x4xf32> to vector<2x4x16x4xf32>
    %18 = arith.subf %14, %17 : vector<2x4x16x4xf32>
    %19 = math.exp %18 : vector<2x4x16x4xf32>
    %cst_17 = arith.constant dense<0.000000e+00> : vector<2x16x4xf32>
    %20 = vector.multi_reduction <add>, %19, %cst_17 [1] : vector<2x4x16x4xf32> to vector<2x16x4xf32>
    %21 = vector.shape_cast %20 : vector<2x16x4xf32> to vector<2x1x16x4xf32>
    %22 = tpu.reciprocal %21 {approx = true} : vector<2x1x16x4xf32> -> vector<2x1x16x4xf32>
    %23 = vector.broadcast %22 : vector<2x1x16x4xf32> to vector<2x4x16x4xf32>
    %24 = arith.mulf %19, %23 : vector<2x4x16x4xf32>
    %25 = vector.extract_strided_slice %13 {offsets = [0, 0], sizes = [4, 4], strides = [1, 1]} : vector<4x8xf32> to vector<4x4xf32>
    %cst_18 = arith.constant dense<0xFF800000> : vector<4xf32>
    %26 = vector.multi_reduction <maximumf>, %25, %cst_18 [1] : vector<4x4xf32> to vector<4xf32>
    %27 = vector.shape_cast %26 : vector<4xf32> to vector<4x1xf32>
    %28 = vector.broadcast %27 : vector<4x1xf32> to vector<4x4xf32>
    %29 = arith.subf %25, %28 : vector<4x4xf32>
    %30 = math.exp %29 : vector<4x4xf32>
    %cst_19 = arith.constant dense<0.000000e+00> : vector<4xf32>
    %31 = vector.multi_reduction <add>, %30, %cst_19 [1] : vector<4x4xf32> to vector<4xf32>
    %32 = vector.shape_cast %31 : vector<4xf32> to vector<4x1xf32>
    %33 = tpu.reciprocal %32 {approx = true} : vector<4x1xf32> -> vector<4x1xf32>
    %34 = vector.broadcast %33 : vector<4x1xf32> to vector<4x4xf32>
    %35 = arith.mulf %30, %34 : vector<4x4xf32>
    %cst_20 = arith.constant 1.000000e+00 : f32
    %36 = vector.broadcast %cst_20 : f32 to vector<4x4xf32>
    %37 = arith.addf %36, %35 : vector<4x4xf32>
    %38 = vector.shape_cast %37 : vector<4x4xf32> to vector<4x1x4xf32>
    %39 = vector.broadcast %0 : f32 to vector<4x1x4xf32>
    %40 = arith.mulf %39, %38 : vector<4x1x4xf32>
    %41 = vector.extract_strided_slice %24 {offsets = [0, 0, 0, 0], sizes = [1, 4, 16, 4], strides = [1, 1, 1, 1]} : vector<2x4x16x4xf32> to vector<1x4x16x4xf32>
    %42 = vector.shape_cast %41 : vector<1x4x16x4xf32> to vector<4x16x4xf32>
    %43 = vector.broadcast %40 : vector<4x1x4xf32> to vector<4x16x4xf32>
    %44 = arith.addf %43, %42 : vector<4x16x4xf32>
    %c0_21 = arith.constant 0 : index
    %c0_22 = arith.constant 0 : index
    %c0_23 = arith.constant 0 : index
    %c0_24 = arith.constant 0 : index
    %45 = vector.load %arg8[%c0_21, %c0_22, %c0_23, %c0_24] : memref<2x4x16x4xf32, #tpu.memory_space<vmem>>, vector<1x4x16x4xf32>
    %46 = vector.shape_cast %45 : vector<1x4x16x4xf32> to vector<4x16x4xf32>
    %47 = vector.shape_cast %44 : vector<4x16x4xf32> to vector<1x4x16x4xf32>
    tpu.vector_store %arg8[%c0_21, %c0_22, %c0_23, %c0_24], %47 {strides = array<i32>} : memref<2x4x16x4xf32, #tpu.memory_space<vmem>>, vector<1x4x16x4xf32>,
    %48 = vector.extract_strided_slice %13 {offsets = [0, 4], sizes = [4, 4], strides = [1, 1]} : vector<4x8xf32> to vector<4x4xf32>
    %cst_25 = arith.constant dense<0xFF800000> : vector<4xf32>
    %49 = vector.multi_reduction <maximumf>, %48, %cst_25 [1] : vector<4x4xf32> to vector<4xf32>
    %50 = vector.shape_cast %49 : vector<4xf32> to vector<4x1xf32>
    %51 = vector.broadcast %50 : vector<4x1xf32> to vector<4x4xf32>
    %52 = arith.subf %48, %51 : vector<4x4xf32>
    %53 = math.exp %52 : vector<4x4xf32>
    %cst_26 = arith.constant dense<0.000000e+00> : vector<4xf32>
    %54 = vector.multi_reduction <add>, %53, %cst_26 [1] : vector<4x4xf32> to vector<4xf32>
    %55 = vector.shape_cast %54 : vector<4xf32> to vector<4x1xf32>
    %56 = tpu.reciprocal %55 {approx = true} : vector<4x1xf32> -> vector<4x1xf32>
    %57 = vector.broadcast %56 : vector<4x1xf32> to vector<4x4xf32>
    %58 = arith.mulf %53, %57 : vector<4x4xf32>
    %cst_27 = arith.constant 1.000000e+00 : f32
    %59 = vector.broadcast %cst_27 : f32 to vector<4x4xf32>
    %60 = arith.addf %59, %58 : vector<4x4xf32>
    %61 = vector.shape_cast %60 : vector<4x4xf32> to vector<4x1x4xf32>
    %62 = vector.broadcast %0 : f32 to vector<4x1x4xf32>
    %63 = arith.mulf %62, %61 : vector<4x1x4xf32>
    %64 = vector.extract_strided_slice %24 {offsets = [1, 0, 0, 0], sizes = [1, 4, 16, 4], strides = [1, 1, 1, 1]} : vector<2x4x16x4xf32> to vector<1x4x16x4xf32>
    %65 = vector.shape_cast %64 : vector<1x4x16x4xf32> to vector<4x16x4xf32>
    %66 = vector.broadcast %63 : vector<4x1x4xf32> to vector<4x16x4xf32>
    %67 = arith.addf %66, %65 : vector<4x16x4xf32>
    %c1 = arith.constant 1 : index
    %c0_28 = arith.constant 0 : index
    %c0_29 = arith.constant 0 : index
    %c0_30 = arith.constant 0 : index
    %68 = vector.load %arg8[%c1, %c0_28, %c0_29, %c0_30] : memref<2x4x16x4xf32, #tpu.memory_space<vmem>>, vector<1x4x16x4xf32>
    %69 = vector.shape_cast %68 : vector<1x4x16x4xf32> to vector<4x16x4xf32>
    %70 = vector.shape_cast %67 : vector<4x16x4xf32> to vector<1x4x16x4xf32>
    tpu.vector_store %arg8[%c1, %c0_28, %c0_29, %c0_30], %70 {strides = array<i32>} : memref<2x4x16x4xf32, #tpu.memory_space<vmem>>, vector<1x4x16x4xf32>,
    return
  }
  func.func @transform_0(%arg0: i32) -> (i32, i32) {
    %c0_i32 = arith.constant 0 : i32
    %c0_i32_0 = arith.constant 0 : i32
    %c0_i32_1 = arith.constant 0 : i32
    return %c0_i32, %c0_i32_0 : i32, i32
  }
  func.func @transform_1(%arg0: i32) -> (i32, i32, i32, i32) {
    %c0_i32 = arith.constant 0 : i32
    %c0_i32_0 = arith.constant 0 : i32
    %c0_i32_1 = arith.constant 0 : i32
    %c0_i32_2 = arith.constant 0 : i32
    %c0_i32_3 = arith.constant 0 : i32
    return %c0_i32, %c0_i32_0, %c0_i32_1, %c0_i32_2 : i32, i32, i32, i32
  }
  func.func @transform_2(%arg0: i32) -> (i32, i32) {
    %c0_i32 = arith.constant 0 : i32
    %c0_i32_0 = arith.constant 0 : i32
    %c0_i32_1 = arith.constant 0 : i32
    return %c0_i32, %c0_i32_0 : i32, i32
  }
  func.func @transform_3(%arg0: i32) -> (i32, i32) {
    %c0_i32 = arith.constant 0 : i32
    %c0_i32_0 = arith.constant 0 : i32
    %c0_i32_1 = arith.constant 0 : i32
    return %c0_i32, %c0_i32_0 : i32, i32
  }
  func.func @transform_4(%arg0: i32) -> (i32, i32) {
    %c0_i32 = arith.constant 0 : i32
    %c0_i32_0 = arith.constant 0 : i32
    %c0_i32_1 = arith.constant 0 : i32
    return %c0_i32, %c0_i32_0 : i32, i32
  }
  func.func @transform_5(%arg0: i32) -> (i32, i32) {
    %c0_i32 = arith.constant 0 : i32
    %c0_i32_0 = arith.constant 0 : i32
    %c0_i32_1 = arith.constant 0 : i32
    return %c0_i32, %c0_i32_0 : i32, i32
  }
  func.func @transform_6(%arg0: i32) -> i32 {
    %c0_i32 = arith.constant 0 : i32
    %c0_i32_0 = arith.constant 0 : i32
    return %c0_i32 : i32
  }
  func.func @transform_7(%arg0: i32) -> (i32, i32, i32, i32) {
    %c0_i32 = arith.constant 0 : i32
    %c0_i32_0 = arith.constant 0 : i32
    %c0_i32_1 = arith.constant 0 : i32
    %c0_i32_2 = arith.constant 0 : i32
    %c0_i32_3 = arith.constant 0 : i32
    return %c0_i32, %c0_i32_0, %c0_i32_1, %c0_i32_2 : i32, i32, i32, i32
  }
}

</mosaic_0001>

<bundles_post_ra>
// kernel: c_att_forward.1
= control target key start
LH: loop header
LB: loop body
LE: loop exit
PB: predicated region body
PF: predicated region fallthrough
CT: control target
= control target key end

     0   :  { %v602_v3 = vmov 0   ;;  %vm78_vm0 = vcmask 130048   ;;  %vm200_vm1 = vcmask 31744   ;;  %vm160_vm2 = vcmask 261120   ;;  %s603_s22 = smov 4   ;;  %s604_s30 = smov 124   ;;  %s964_s0 = inlined_call_operand.vmem [shape: f32[144,8], index: 0, kind: input, shape index: {}]   ;;  %s965_s2 = inlined_call_operand.vmem [shape: f32[32,144], index: 2, kind: input, shape index: {}]   ;;  %s966_s3 = inlined_call_operand.vmem [shape: f32[32,1], index: 3, kind: input, shape index: {}]   ;;  %s967_s5 = inlined_call_operand.vmem [shape: f32[4,1], index: 5, kind: input, shape index: {}]   ;;  %s968_s1 = inlined_call_operand.vmem [shape: f32[2,4,16,4], index: 1, kind: input, shape index: {}]   ;;  %s969_s4 = inlined_call_operand.vmem [shape: f32[4,32], index: 4, kind: input, shape index: {}]   ;;  %s970_s6 = inlined_call_operand.<no memory space> [shape: f32[1], index: 6, kind: input, shape index: {}]   ;;  %s971_s7 = inlined_call_operand.vmem [shape: f32[2,4,16,4], index: 7, kind: output, shape index: {}]  }
   0x1   :  { %v51_v0 = vld [vmem:[%s964_s0 + $0x78] sm:$0xff]  ;;  %v50_v1 = vld [vmem:[%s964_s0 + $0x70] sm:$0xff]  ;;  %v49_v2 = vld [vmem:[%s964_s0 + $0x68] sm:$0xff]  ;;  %552 = vset.pattern.permute.xlu1 %v602_v3  ;;  %551 = vset.pattern.permute.xlu0 %v602_v3  ;;  %vm378_vm3 = vcmask 60448   ;;  %vm325_vm4 = vcmask 27648  }
   0x2   :  { %91 = vmatpush.msra.mxu0 %v51_v0  ;;  %516 = vmatpush.msra.mxu2 %v51_v0  ;;  %v53_v4 = vld [vmem:[%s964_s0 + $0x88] sm:$0xff]  ;;  %v48_v5 = vld [vmem:[%s964_s0 + $0x60] sm:$0xff]  ;;  %v47_v8 = vld [vmem:[%s964_s0 + $0x58] sm:$0xff] }
   0x3   :  { %517 = vmatpush.msra.mxu3 %v51_v0  ;;  %134 = vmatpush.msra.mxu1 %v53_v4  ;;  %v52_v6 = vld [vmem:[%s964_s0 + $0x80] sm:$0xff]  ;;  %v29_v7 = vld [vmem:[%s965_s2 + $0x8] sm:$0xff]  ;;  %v46_v10 = vld [vmem:[%s964_s0 + $0x50] sm:$0xff] }
   0x4   :  { %92 = vmatpush.msra.mxu0 %v50_v1  ;;  %518 = vmatpush.msra.mxu2 %v50_v1  ;;  %v55_v9 = vld [vmem:[%s966_s3 + $0x8] sm:$0xff]  ;;  %v57_v12 = vld [vmem:[%s966_s3 + $0x18] sm:$0xff]  ;;  %v44_v13 = vld [vmem:[%s964_s0 + $0x40] sm:$0xff] }
   0x5   :  { %519 = vmatpush.msra.mxu3 %v50_v1  ;;  %135 = vmatpush.msra.mxu1 %v52_v6  ;;  %v45_v11 = vld [vmem:[%s964_s0 + $0x48] sm:$0xff]  ;;  %v31_v14 = vld [vmem:[%s965_s2 + $0x18] sm:$0xff]  ;;  %v54_v16 = vld [vmem:[%s966_s3] sm:$0xff] }
   0x6   :  { %93 = vmatpush.msra.mxu0 %v49_v2  ;;  %520 = vmatpush.msra.mxu2 %v49_v2  ;;  %v43_v15 = vld [vmem:[%s964_s0 + $0x38] sm:$0xff]  ;;  %v42_v17 = vld [vmem:[%s964_s0 + $0x30] sm:$0xff]  ;;  %v41_v18 = vld [vmem:[%s964_s0 + $0x28] sm:$0xff] }
   0x7   :  { %521 = vmatpush.msra.mxu3 %v49_v2  ;;  %503 = vmatmul.msk.f32.vlgmr.msra.gmra.mxu1 %vm78_vm0, %v29_v7  ;;  %v56_v19 = vld [vmem:[%s966_s3 + $0x10] sm:$0xff]  ;;  %v40_v20 = vld [vmem:[%s964_s0 + $0x20] sm:$0xff]  ;;  %v33_v21 = vld [vmem:[%s965_s2 + $0x28] sm:$0xff] }
   0x8   :  { %94 = vmatpush.msra.mxu0 %v48_v5  ;;  %522 = vmatpush.msra.mxu2 %v48_v5  ;;  %v39_v22 = vld [vmem:[%s964_s0 + $0x18] sm:$0xff]  ;;  %v38_v23 = vld [vmem:[%s964_s0 + $0x10] sm:$0xff]  ;;  %v37_v24 = vld [vmem:[%s964_s0 + $0x8] sm:$0xff] }
   0x9   :  { %523 = vmatpush.msra.mxu3 %v48_v5  ;;  %65 = vperm.xlu1 %552, %v55_v9   ;;  %v36_v25 = vld [vmem:[%s964_s0] sm:$0xff]  ;;  %v30_v27 = vld [vmem:[%s965_s2 + $0x10] sm:$0xff]  ;;  %v35_v29 = vld [vmem:[%s965_s2 + $0x38] sm:$0xff] }
   0xa   :  { %95 = vmatpush.msra.mxu0 %v47_v8  ;;  %524 = vmatpush.msra.mxu2 %v47_v8  ;;  %v28_v26 = vld [vmem:[%s965_s2] sm:$0xff]  ;;  %v34_v30 = vld [vmem:[%s965_s2 + $0x30] sm:$0xff]  ;;  %v193_v34 = vld [vmem:[%s968_s1 + $0x48] sm:$0xff] }
   0xb   :  { %525 = vmatpush.msra.mxu3 %v47_v8  ;;  %75 = vperm.xlu0 %551, %v57_v12   ;;  %v32_v28 = vld [vmem:[%s965_s2 + $0x20] sm:$0xff]  ;;  %v195_v35 = vld [vmem:[%s968_s1 + $0x58] sm:$0xff]  ;;  %v197_v36 = vld [vmem:[%s968_s1 + $0x68] sm:$0xff]  ;;  %v222_v38 = vsel %vm200_vm1, %v193_v34, -inf }
   0xc   :  { %96 = vmatpush.msra.mxu0 %v46_v10  ;;  %526 = vmatpush.msra.mxu2 %v46_v10  ;;  %v154_v33 = vld [vmem:[%s967_s5] sm:$0xf]  ;;  %v199_v37 = vld [vmem:[%s968_s1 + $0x78] sm:$0xff]  ;;  %v223_v39 = vsel %vm200_vm1, %v195_v35, -inf  ;;  %v225_v41 = vsel %vm200_vm1, %v197_v36, -inf }
   0xd   :  { %527 = vmatpush.msra.mxu3 %v46_v10  ;;  %553 = vset.pattern.permute.xlu2 %v602_v3  ;;  %v224_v40 = vmax.f32 %v222_v38, %v223_v39  ;;  %v227_v42 = vsel %vm200_vm1, %v199_v37, -inf }
   0xe   :  { %97 = vmatpush.msra.mxu0 %v45_v11  ;;  %528 = vmatpush.msra.mxu2 %v45_v11 }
   0xf   :  { %529 = vmatpush.msra.mxu3 %v45_v11  ;;  %504 = vmatmul.msk.f32.gmra.mxu1 %vm78_vm0, %v31_v14  ;;  %v226_v44 = vmax.f32 %v224_v40, %v225_v41 }
  0x10   :  { %98 = vmatpush.msra.mxu0 %v44_v13  ;;  %530 = vmatpush.msra.mxu2 %v44_v13 }
  0x11   :  { %531 = vmatpush.msra.mxu3 %v44_v13  ;;  %60 = vperm.xlu1 %552, %v54_v16   ;;  %v228_v45 = vmax.f32 %v226_v44, %v227_v42 }
  0x12   :  { %99 = vmatpush.msra.mxu0 %v43_v15  ;;  %532 = vmatpush.msra.mxu2 %v43_v15 }
  0x13   :  { %533 = vmatpush.msra.mxu3 %v43_v15  ;;  %70 = vperm.xlu0 %551, %v56_v19   ;;  %v238_v48 = vsub.f32 %v193_v34, %v228_v45  ;;  %v240_v49 = vsub.f32 %v195_v35, %v228_v45  ;;  %v242_v50 = vsub.f32 %v197_v36, %v228_v45  ;;  %v198_v34 = vld [vmem:[%s968_s1 + $0x70] sm:$0xff] }
  0x14   :  { %100 = vmatpush.msra.mxu0 %v42_v17  ;;  %534 = vmatpush.msra.mxu2 %v42_v17  ;;  %v244_v51 = vsub.f32 %v199_v37, %v228_v45  ;;  %v220_v39 = vsel %vm200_vm1, %v198_v34, -inf }
  0x15   :  { %535 = vmatpush.msra.mxu3 %v42_v17  ;;  %157 = vperm.xlu2 %553, %v154_v33   ;;  %v263_v53 = vmul.f32 1.442695, %v238_v48  ;;  %v267_v54 = vmul.f32 1.442695, %v240_v49  ;;  %v271_v55 = vmul.f32 1.442695, %v242_v50 }
  0x16   :  { %101 = vmatpush.msra.mxu0 %v41_v18  ;;  %536 = vmatpush.msra.mxu2 %v41_v18  ;;  %v275_v56 = vmul.f32 1.442695, %v244_v51  ;;  %v196_v33 = vld [vmem:[%s968_s1 + $0x60] sm:$0xff] }
  0x17   :  { %537 = vmatpush.msra.mxu3 %v41_v18  ;;  %505 = vmatmul.msk.f32.gmra.mxu1 %vm78_vm0, %v33_v21  ;;  %554 = vpow2.f32 %v263_v53  ;;  %v218_v37 = vsel %vm200_vm1, %v196_v33, -inf }
  0x18   :  { %102 = vmatpush.msra.mxu0 %v40_v20  ;;  %538 = vmatpush.msra.mxu2 %v40_v20  ;;  %556 = vpow2.f32 %v267_v54 }
  0x19   :  { %539 = vmatpush.msra.mxu3 %v40_v20  ;;  %558 = vpow2.f32 %v271_v55 }
  0x1a   :  { %103 = vmatpush.msra.mxu0 %v39_v22  ;;  %540 = vmatpush.msra.mxu2 %v39_v22  ;;  %560 = vpow2.f32 %v275_v56 }
  0x1b   :  { %541 = vmatpush.msra.mxu3 %v39_v22  ;;  %v153_v22 = vld [vmem:[%s969_s4] sm:$0xf] }
  0x1c   :  { %104 = vmatpush.msra.mxu0 %v38_v23  ;;  %542 = vmatpush.msra.mxu2 %v38_v23 }
  0x1d   :  { %543 = vmatpush.msra.mxu3 %v38_v23  ;;  %v555_v62 = vpop.eup %554 }
  0x1e   :  { %105 = vmatpush.msra.mxu0 %v37_v24  ;;  %544 = vmatpush.msra.mxu2 %v37_v24  ;;  %v758_v1 = vpop.eup %556  ;;  %v298_v4 = vsel %vm200_vm1, %v555_v62, 0.0 }
  0x1f   :  { %545 = vmatpush.msra.mxu3 %v37_v24  ;;  %506 = vmatmul.msk.f32.gmra.mxu1 %vm78_vm0, %v35_v29  ;;  %v559_v5 = vpop.eup %558  ;;  %v299_v7 = vsel %vm200_vm1, %v758_v1, 0.0 }
  0x20   :  { %106 = vmatpush.msra.mxu0 %v36_v25  ;;  %546 = vmatpush.msra.mxu2 %v36_v25  ;;  %v763_v8 = vpop.eup %560  ;;  %v300_v11 = vadd.f32 %v299_v7, %v298_v4  ;;  %v301_v12 = vsel %vm200_vm1, %v559_v5, 0.0 }
  0x21   :  { %547 = vmatpush.msra.mxu3 %v36_v25  ;;  %107 = vmatmul.f32.vlgmr.msra.gmra.mxu0 %v28_v26  ;;  %v303_v13 = vsel %vm200_vm1, %v763_v8, 0.0 }
  0x22   :  { %110 = vmatmul.f32.vlgmr.msra.gmra.mxu2 %v30_v27  ;;  %113 = vmatmul.f32.vlgmr.msra.gmra.mxu3 %v32_v28  ;;  %v302_v16 = vadd.f32 %v301_v12, %v300_v11  ;;  %v184_v12 = vld [vmem:[%s968_s1] sm:$0xff] }
  0x24   :  { %v304_v19 = vadd.f32 %v303_v13, %v302_v16  ;;  %v186_v13 = vld [vmem:[%s968_s1 + $0x10] sm:$0xff]  ;;  %v201_v16 = vsel %vm200_vm1, %v184_v12, -inf }
  0x26   :  { %562 = vrcp.f32 %v304_v19 }
  0x2a   :  { %116 = vmatmul.f32.gmra.mxu3 %v34_v30 }
  0x2c   :  { %v771_v23 = vpop.eup %562 }
  0x2d   :  { %v318_v24 = vmul.f32 %v771_v23, %v555_v62  ;;  %v322_v30 = vmul.f32 %v771_v23, %v559_v5 }
  0x2f   :  { %428 = vrot.lane.b32.xlu1 %v318_v24, %s603_s22 }
  0x6f   :  { %v158_v25 = vpop.permute.xlu2 %157 }
  0x7b   :  { %v66_v46 = vpop.permute.xlu1 %65 }
  0x7d   :  { %v76_v43 = vpop.permute.xlu0 %75 }
  0x83   :  { %v61_v59 = vpop.permute.xlu1 %60 }
  0x84   :  { %v137_v31 = vpop.f32.mrf.mxu1 }
  0x85   :  { %v71_v57 = vpop.permute.xlu0 %70 }
  0x8c   :  { %v140_v32 = vpop.f32.mrf.mxu1 }
  0x94   :  { %v143_v47 = vpop.f32.mrf.mxu1 }
  0x9c   :  { %v146_v0 = vpop.f32.mrf.mxu1 }
  0x9e   :  { %v108_v60 = vpop.f32.mrf.mxu0 }
  0x9f   :  { %v109_v6 = vadd.f32 %v108_v60, %v61_v59 }
  0xa1   :  { %v138_v18 = vadd.f32 %v137_v31, %v109_v6  ;;  %v192_v31 = vld [vmem:[%s968_s1 + $0x40] sm:$0xff]  ;;  %v794_v42 = vpop.permute.xlu1 %428 }
  0xa2   :  { %v215_v35 = vsel %vm200_vm1, %v192_v31, -inf }
  0xa3   :  { %v149_v21 = vmax.f32 %v138_v18, 0.0  ;;  %v188_v18 = vld [vmem:[%s968_s1 + $0x20] sm:$0xff] }
  0xa4   :  { %v204_v24 = vsel %vm200_vm1, %v188_v18, -inf }
  0xa5   :  { %v114_v52 = vpop.f32.mrf.mxu3  ;;  %v111_v58 = vpop.f32.mrf.mxu2 }
  0xa6   :  { %v115_v61 = vadd.f32 %v114_v52, %v71_v57  ;;  %v112_v2 = vadd.f32 %v111_v58, %v66_v46 }
  0xa8   :  { %v144_v9 = vadd.f32 %v143_v47, %v115_v61  ;;  %v141_v15 = vadd.f32 %v140_v32, %v112_v2  ;;  %v194_v32 = vld [vmem:[%s968_s1 + $0x50] sm:$0xff] }
  0xa9   :  { %v216_v36 = vsel %vm200_vm1, %v194_v32, -inf }
  0xaa   :  { %v151_v17 = vmax.f32 %v144_v9, 0.0  ;;  %v150_v20 = vmax.f32 %v141_v15, 0.0  ;;  %v217_v38 = vmax.f32 %v215_v35, %v216_v36  ;;  %v187_v15 = vld [vmem:[%s968_s1 + $0x18] sm:$0xff] }
  0xac   :  { %v219_v40 = vmax.f32 %v217_v38, %v218_v37 }
  0xad   :  { %v117_v63 = vpop.f32.mrf.mxu3 }
  0xae   :  { %v118_v3 = vadd.f32 %v117_v63, %v76_v43  ;;  %v221_v41 = vmax.f32 %v219_v40, %v220_v39 }
  0xb0   :  { %v147_v10 = vadd.f32 %v146_v0, %v118_v3  ;;  %v237_v43 = vsub.f32 %v192_v31, %v221_v41  ;;  %v239_v44 = vsub.f32 %v194_v32, %v221_v41  ;;  %v241_v45 = vsub.f32 %v196_v33, %v221_v41 }
  0xb1   :  { %v243_v46 = vsub.f32 %v198_v34, %v221_v41 }
  0xb2   :  { %v152_v14 = vmax.f32 %v147_v10, 0.0  ;;  %v261_v47 = vmul.f32 1.442695, %v237_v43  ;;  %v265_v48 = vmul.f32 1.442695, %v239_v44 }
  0xb3   :  { %v269_v49 = vmul.f32 1.442695, %v241_v45  ;;  %v273_v50 = vmul.f32 1.442695, %v243_v46 }
  0xb4   :  { %176 = vmatpush.msrb.mxu1 %v152_v14  ;;  %564 = vpow2.f32 %v261_v47  ;;  %v185_v14 = vld [vmem:[%s968_s1 + $0x8] sm:$0xff] }
  0xb5   :  { %566 = vpow2.f32 %v265_v48  ;;  %v208_v19 = vsel %vm200_vm1, %v185_v14, -inf }
  0xb6   :  { %177 = vmatpush.msrb.mxu1 %v151_v17  ;;  %568 = vpow2.f32 %v269_v49  ;;  %v202_v17 = vsel %vm200_vm1, %v186_v13, -inf }
  0xb7   :  { %570 = vpow2.f32 %v273_v50 }
  0xb8   :  { %178 = vmatpush.msrb.mxu1 %v150_v20  ;;  %v209_v20 = vsel %vm200_vm1, %v187_v15, -inf }
  0xba   :  { %179 = vmatpush.msrb.mxu1 %v149_v21  ;;  %v796_v51 = vpop.eup %564  ;;  %v189_v21 = vld [vmem:[%s968_s1 + $0x28] sm:$0xff] }
  0xbb   :  { %507 = vmatmul.msk.f32.vlgmr.msrb.gmra.mxu1 %vm160_vm2, %v153_v22  ;;  %v567_v54 = vpop.eup %566  ;;  %v291_v57 = vsel %vm200_vm1, %v796_v51, 0.0  ;;  %v203_v22 = vmax.f32 %v201_v16, %v202_v17 }
  0xbc   :  { %v800_v58 = vpop.eup %568  ;;  %v292_v59 = vsel %vm200_vm1, %v567_v54, 0.0 }
  0xbd   :  { %v571_v60 = vpop.eup %570  ;;  %v293_v63 = vadd.f32 %v292_v59, %v291_v57  ;;  %v294_v0 = vsel %vm200_vm1, %v800_v58, 0.0 }
  0xbe   :  { %v296_v2 = vsel %vm200_vm1, %v571_v60, 0.0 }
  0xbf   :  { %v295_v3 = vadd.f32 %v294_v0, %v293_v63 }
  0xc1   :  { %v297_v4 = vadd.f32 %v296_v2, %v295_v3 }
 0x138   :  { %v181_v26 = vpop.f32.mrf.mxu1 }
 0x139   :  { %v182_v27 = vadd.f32 %v181_v26, %v158_v25  ;;  %v190_v25 = vld [vmem:[%s968_s1 + $0x30] sm:$0xff]  ;;  %v210_v26 = vmax.f32 %v208_v19, %v209_v20 }
 0x13b   :  { %v379_v28 = vsel %vm378_vm3, %v182_v27, -inf  ;;  %v326_v29 = vsel %vm325_vm4, %v182_v27, -inf }
 0x13c   :  { %380 = vmax.xlane.f32.xlu2 %v379_v28  ;;  %327 = vmax.xlane.f32.xlu1 %v326_v29  ;;  %v191_v28 = vld [vmem:[%s968_s1 + $0x38] sm:$0xff]  ;;  %v205_v29 = vmax.f32 %v203_v22, %v204_v24 }
 0x13d   :  { %v213_v32 = vsel %vm200_vm1, %v191_v28, -inf }
 0x155   :  { %436 = vrot.lane.b32.xlu1 %v322_v30, %s603_s22  ;;  %v206_v30 = vsel %vm200_vm1, %v190_v25, -inf }
 0x156   :  { %v207_v33 = vmax.f32 %v205_v29, %v206_v30  ;;  %v324_v30 = vmul.f32 %v771_v23, %v763_v8 }
 0x158   :  { %v229_v35 = vsub.f32 %v184_v12, %v207_v33  ;;  %v231_v36 = vsub.f32 %v186_v13, %v207_v33  ;;  %v233_v40 = vsub.f32 %v188_v18, %v207_v33  ;;  %v235_v46 = vsub.f32 %v190_v25, %v207_v33 }
 0x15a   :  { %v245_v39 = vmul.f32 1.442695, %v229_v35  ;;  %v249_v41 = vmul.f32 1.442695, %v231_v36  ;;  %v253_v47 = vmul.f32 1.442695, %v233_v40 }
 0x15b   :  { %v257_v50 = vmul.f32 1.442695, %v235_v46 }
 0x1af   :  { %v381_v52 = vpop.xlane.xlu2 %380  ;;  %v328_v53 = vpop.xlane.xlu1 %327 }
 0x1b0   :  { %v382_v55 = vsub.f32 %v182_v27, %v381_v52  ;;  %v329_v56 = vsub.f32 %v182_v27, %v328_v53  ;;  %v211_v27 = vsel %vm200_vm1, %v189_v21, -inf }
 0x1b1   :  { %v212_v31 = vmax.f32 %v210_v26, %v211_v27  ;;  %v876_v26 = vstv %s970_s6 }
 0x1b2   :  { %v383_v61 = vmul.f32 1.442695, %v382_v55  ;;  %v330_v62 = vmul.f32 1.442695, %v329_v56 }
 0x1b3   :  { %v214_v34 = vmax.f32 %v212_v31, %v213_v32 }
 0x1b4   :  { %572 = vpow2.f32 %v383_v61 }
 0x1b5   :  { %574 = vpow2.f32 %v330_v62  ;;  %v230_v37 = vsub.f32 %v185_v14, %v214_v34  ;;  %v232_v38 = vsub.f32 %v187_v15, %v214_v34  ;;  %v234_v44 = vsub.f32 %v189_v21, %v214_v34 }
 0x1b6   :  { %576 = vrcp.f32 %v297_v4  ;;  %v236_v48 = vsub.f32 %v191_v28, %v214_v34  ;;  %v320_v15 = vmul.f32 %v771_v23, %v758_v1 }
 0x1b7   :  { %v247_v43 = vmul.f32 1.442695, %v230_v37  ;;  %v251_v45 = vmul.f32 1.442695, %v232_v38  ;;  %578 = vpow2.f32 %v245_v39  ;;  %v255_v49 = vmul.f32 1.442695, %v234_v44 }
 0x1b8   :  { %580 = vpow2.f32 %v249_v41 }
 0x1b9   :  { %582 = vpow2.f32 %v247_v43 }
 0x1ba   :  { %v806_v5 = vpop.eup %572  ;;  %584 = vpow2.f32 %v251_v45 }
 0x1bb   :  { %v808_v6 = vpop.eup %574  ;;  %386 = vrot.lane.b32.xlu0 %v806_v5, %s604_s30  ;;  %586 = vpow2.f32 %v253_v47 }
 0x1bc   :  { %v332_v7 = vsel %vm325_vm4, %v808_v6, 0.0  ;;  %v814_v9 = vpop.eup %576  ;;  %588 = vpow2.f32 %v255_v49 }
 0x1bd   :  { %333 = vadd.xlane.f32.xlu1 %v332_v7  ;;  %v319_v10 = vmul.f32 %v814_v9, %v567_v54  ;;  %v323_v11 = vmul.f32 %v814_v9, %v571_v60  ;;  %v579_v52 = vpop.eup %578  ;;  %v259_v54 = vmul.f32 1.442695, %v236_v48  ;;  %590 = vpow2.f32 %v257_v50 }
 0x1be   :  { %v581_v53 = vpop.eup %580  ;;  %v277_v57 = vsel %vm200_vm1, %v579_v52, 0.0  ;;  %v317_v63 = vmul.f32 %v814_v9, %v796_v51  ;;  %v321_v22 = vmul.f32 %v814_v9, %v800_v58 }
 0x1bf   :  { %v583_v55 = vpop.eup %582  ;;  %v278_v59 = vsel %vm200_vm1, %v581_v53, 0.0  ;;  %592 = vpow2.f32 %v259_v54 }
 0x1c0   :  { %v585_v56 = vpop.eup %584  ;;  %v284_v61 = vsel %vm200_vm1, %v583_v55, 0.0  ;;  %v279_v3 = vadd.f32 %v278_v59, %v277_v57  ;;  %426 = vrot.lane.b32.xlu2 %v317_v63, %s603_s22 }
 0x1c1   :  { %v587_v60 = vpop.eup %586  ;;  %v285_v62 = vsel %vm200_vm1, %v585_v56, 0.0 }
 0x1c2   :  { %v589_v0 = vpop.eup %588  ;;  %v280_v4 = vsel %vm200_vm1, %v587_v60, 0.0 }
 0x1c3   :  { %430 = vrot.lane.b32.xlu0 %v319_v10, %s603_s22  ;;  %v591_v7 = vpop.eup %590  ;;  %v286_v10 = vadd.f32 %v285_v62, %v284_v61  ;;  %v281_v13 = vadd.f32 %v280_v4, %v279_v3 }
 0x1c4   :  { %v282_v14 = vsel %vm200_vm1, %v591_v7, 0.0 }
 0x1c5   :  { %v593_v12 = vpop.eup %592  ;;  %v283_v19 = vadd.f32 %v282_v14, %v281_v13 }
 0x1c6   :  { %v289_v17 = vsel %vm200_vm1, %v593_v12, 0.0 }
 0x1c7   :  { %v858_v2 = vpop.permute.xlu1 %436 }
 0x1c8   :  { %432 = vrot.lane.b32.xlu2 %v320_v15, %s603_s22 }
 0x1cb   :  { %438 = vrot.lane.b32.xlu0 %v323_v11, %s603_s22  ;;  %v287_v11 = vsel %vm200_vm1, %v589_v0, 0.0 }
 0x1cc   :  { %v288_v51 = vadd.f32 %v287_v11, %v286_v10 }
 0x1ce   :  { %v290_v20 = vadd.f32 %v289_v17, %v288_v51 }
 0x1d0   :  { %434 = vrot.lane.b32.xlu2 %v321_v22, %s603_s22 }
 0x1d8   :  { %440 = vrot.lane.b32.xlu2 %v324_v30, %s603_s22 }
 0x21a   :  { %v427_v59 = vpop.permute.xlu2 %426 }
 0x22d   :  { %v387_v16 = vpop.permute.xlu0 %386 }
 0x22e   :  { %v389_v18 = vsel %vm325_vm4, %v387_v16, 0.0 }
 0x22f   :  { %390 = vadd.xlane.f32.xlu0 %v389_v18 }
 0x230   :  { %v334_v21 = vpop.xlane.xlu1 %333 }
 0x231   :  { %594 = vrcp.f32 %v334_v21 }
 0x232   :  { %596 = vrcp.f32 %v283_v19 }
 0x233   :  { %598 = vrcp.f32 %v290_v20 }
 0x235   :  { %v431_v54 = vpop.permute.xlu0 %430 }
 0x237   :  { %v595_v24 = vpop.eup %594 }
 0x238   :  { %v597_v1 = vpop.eup %596  ;;  %v336_v25 = vmul.f32 %v595_v24, %v808_v6 }
 0x239   :  { %v599_v27 = vpop.eup %598  ;;  %v309_v29 = vmul.f32 %v597_v1, %v579_v52  ;;  %v311_v34 = vmul.f32 %v597_v1, %v581_v53  ;;  %v313_v6 = vmul.f32 %v597_v1, %v587_v60  ;;  %v315_v41 = vmul.f32 %v597_v1, %v591_v7  ;;  %v433_v7 = vpop.permute.xlu2 %432 }
 0x23a   :  { %v337_v28 = vadd.f32 1.0, %v336_v25  ;;  %v310_v33 = vmul.f32 %v599_v27, %v583_v55  ;;  %v312_v35 = vmul.f32 %v599_v27, %v585_v56  ;;  %v314_v40 = vmul.f32 %v599_v27, %v589_v0 }
 0x23b   :  { %v316_v45 = vmul.f32 %v599_v27, %v593_v12 }
 0x23c   :  { %v339_v31 = vrot.slane %v337_v28, 1  ;;  %v340_v58 = vrot.slane %v337_v28, 2  ;;  %v341_v9 = vrot.slane %v337_v28, 3  ;;  %v346_v32 = vmul.f32 %v876_v26, %v337_v28 }
 0x23d   :  { %v439_v55 = vpop.permute.xlu0 %438 }
 0x23e   :  { %v347_v36 = vmul.f32 %v876_v26, %v339_v31  ;;  %v348_v37 = vmul.f32 %v876_v26, %v340_v58  ;;  %v349_v38 = vmul.f32 %v876_v26, %v341_v9  ;;  %v354_v39 = vperm.slane %v346_v32, 0 }
 0x240   :  { %v355_v8 = vperm.slane %v347_v36, 0  ;;  %v356_v23 = vperm.slane %v348_v37, 0  ;;  %v357_v43 = vperm.slane %v349_v38, 0  ;;  %v362_v44 = vadd.f32 %v354_v39, %v309_v29 }
 0x241   :  { %v363_v46 = vadd.f32 %v354_v39, %v310_v33  ;;  %v435_v15 = vpop.permute.xlu2 %434 }
 0x242   :  { %v364_v47 = vadd.f32 %v355_v8, %v311_v34  ;;  %v365_v48 = vadd.f32 %v355_v8, %v312_v35  ;;  %v366_v49 = vadd.f32 %v356_v23, %v313_v6  ;;  %370 = vst.msk [vmem:[%s971_s7] sm:$0xff] %vm200_vm1, %v362_v44  ;;  %v367_v50 = vadd.f32 %v356_v23, %v314_v40 }
 0x243   :  { %371 = vst.msk [vmem:[%s971_s7 + $0x8] sm:$0xff] %vm200_vm1, %v363_v46  ;;  %v368_v52 = vadd.f32 %v357_v43, %v315_v41  ;;  %v369_v53 = vadd.f32 %v357_v43, %v316_v45 }
 0x244   :  { %372 = vst.msk [vmem:[%s971_s7 + $0x10] sm:$0xff] %vm200_vm1, %v364_v47 }
 0x245   :  { %373 = vst.msk [vmem:[%s971_s7 + $0x18] sm:$0xff] %vm200_vm1, %v365_v48 }
 0x246   :  { %374 = vst.msk [vmem:[%s971_s7 + $0x20] sm:$0xff] %vm200_vm1, %v366_v49 }
 0x247   :  { %375 = vst.msk [vmem:[%s971_s7 + $0x28] sm:$0xff] %vm200_vm1, %v367_v50 }
 0x248   :  { %376 = vst.msk [vmem:[%s971_s7 + $0x30] sm:$0xff] %vm200_vm1, %v368_v52 }
 0x249   :  { %377 = vst.msk [vmem:[%s971_s7 + $0x38] sm:$0xff] %vm200_vm1, %v369_v53  ;;  %v441_v20 = vpop.permute.xlu2 %440 }
 0x2a2   :  { %v391_v56 = vpop.xlane.xlu0 %390 }
 0x2a3   :  { %600 = vrcp.f32 %v391_v56 }
 0x2a9   :  { %v601_v57 = vpop.eup %600 }
 0x2aa   :  { %v393_v60 = vmul.f32 %v601_v57, %v806_v5 }
 0x2ac   :  { %v394_v61 = vadd.f32 1.0, %v393_v60 }
 0x2ae   :  { %v396_v62 = vrot.slane %v394_v61, 1  ;;  %v402_v63 = vmul.f32 %v394_v61, %v876_v26  ;;  %v397_v12 = vrot.slane %v394_v61, 2  ;;  %v398_v16 = vrot.slane %v394_v61, 3 }
 0x2b0   :  { %v410_v0 = vperm.slane %v402_v63, 0  ;;  %v403_v3 = vmul.f32 %v396_v62, %v876_v26  ;;  %v404_v5 = vmul.f32 %v397_v12, %v876_v26 }
 0x2b2   :  { %v451_v4 = vadd.f32 %v794_v42, %v410_v0  ;;  %v450_v10 = vadd.f32 %v427_v59, %v410_v0  ;;  %v411_v11 = vperm.slane %v403_v3, 0  ;;  %v412_v51 = vperm.slane %v404_v5, 0 }
 0x2b3   :  { %v405_v42 = vmul.f32 %v398_v16, %v876_v26 }
 0x2b4   :  { %468 = vrot.lane.b32.xlu2 %v451_v4, %s604_s30  ;;  %466 = vrot.lane.b32.xlu0 %v450_v10, %s604_s30  ;;  %v453_v13 = vadd.f32 %v433_v7, %v411_v11  ;;  %v452_v14 = vadd.f32 %v431_v54, %v411_v11  ;;  %v455_v17 = vadd.f32 %v858_v2, %v412_v51 }
 0x2b5   :  { %v454_v18 = vadd.f32 %v435_v15, %v412_v51  ;;  %v413_v19 = vperm.slane %v405_v42, 0 }
 0x2b7   :  { %v457_v21 = vadd.f32 %v441_v20, %v413_v19  ;;  %v456_v22 = vadd.f32 %v439_v55, %v413_v19 }
 0x2bc   :  { %472 = vrot.lane.b32.xlu2 %v453_v13, %s604_s30  ;;  %470 = vrot.lane.b32.xlu0 %v452_v14, %s604_s30 }
 0x2c4   :  { %476 = vrot.lane.b32.xlu2 %v455_v17, %s604_s30  ;;  %474 = vrot.lane.b32.xlu0 %v454_v18, %s604_s30 }
 0x2cc   :  { %480 = vrot.lane.b32.xlu2 %v457_v21, %s604_s30  ;;  %478 = vrot.lane.b32.xlu0 %v456_v22, %s604_s30 }
 0x30e   :  { %v469_v24 = vpop.permute.xlu2 %468 }
 0x30f   :  { %509 = vst.msk [vmem:[%s971_s7 + $0x48] sm:$0xff] %vm200_vm1, %v469_v24 }
 0x316   :  { %v473_v2 = vpop.permute.xlu2 %472 }
 0x317   :  { %511 = vst.msk [vmem:[%s971_s7 + $0x58] sm:$0xff] %vm200_vm1, %v473_v2 }
 0x31e   :  { %v477_v1 = vpop.permute.xlu2 %476 }
 0x31f   :  { %513 = vst.msk [vmem:[%s971_s7 + $0x68] sm:$0xff] %vm200_vm1, %v477_v1 }
 0x326   :  { %v481_v25 = vpop.permute.xlu2 %480  ;;  %v467_v26 = vpop.permute.xlu0 %466 }
 0x327   :  { %515 = vst.msk [vmem:[%s971_s7 + $0x78] sm:$0xff] %vm200_vm1, %v481_v25 }
 0x328   :  { %508 = vst.msk [vmem:[%s971_s7 + $0x40] sm:$0xff] %vm200_vm1, %v467_v26 }
 0x32e   :  { %v471_v27 = vpop.permute.xlu0 %470 }
 0x32f   :  { %510 = vst.msk [vmem:[%s971_s7 + $0x50] sm:$0xff] %vm200_vm1, %v471_v27 }
 0x336   :  { %v475_v28 = vpop.permute.xlu0 %474 }
 0x337   :  { %512 = vst.msk [vmem:[%s971_s7 + $0x60] sm:$0xff] %vm200_vm1, %v475_v28 }
 0x33e   :  { %v479_v29 = vpop.permute.xlu0 %478 }
 0x33f   :  { %514 = vst.msk [vmem:[%s971_s7 + $0x70] sm:$0xff] %vm200_vm1, %v479_v29 }

</bundles_post_ra>
